<compile_context>
chip_gen: v5e
topology: v5e:2x2
jax: 0.10.0
libtpu: 0.0.40
codegen_flags: <defaults>
</compile_context>

<pallas_src>
import functools

import jax
import jax.numpy as jnp
from jax.experimental import pallas as pl
from jax.experimental.pallas import tpu as pltpu

_LANE = 128


def _round_up(v: int, m: int) -> int:
    return -(-v // m) * m


@functools.cache
def _chip_tuning():
    """Returns (block_bytes, vmem_limit_bytes_or_None, has_bf16_vpu)."""
    try:
        kind = jax.devices()[0].device_kind.lower()
    except Exception:  # pragma: no cover - defensive only
        kind = ""
    if "v5" in kind:
        # v5e: 16 MiB scoped-VMEM default, ~0.8 TB/s HBM -> 2 MiB blocks are
        # already <10% step overhead; VPU has no bf16, compute in f32.
        return 2 << 20, None, False
    if "v6" in kind:
        # v6e: ~1.4 TB/s HBM; 4 MiB blocks (2 in + 2 out bufs = 16 MiB) fit
        # the 32 MiB scoped-VMEM default.
        return 4 << 20, None, True
    if "7" in kind:
        # v7x: ~3.2 TB/s HBM; 8 MiB blocks need the scoped limit raised past
        # the 32 MiB default (physical VMEM is 64 MiB per TensorCore).
        return 8 << 20, 40 << 20, True
    # Unknown / future chips: conservative middle ground with explicit limit.
    return 4 << 20, 32 << 20, True


def _h_swish_kernel(x_ref, o_ref, *, compute_dtype):
    # h_sigmoid(x) = relu6(x + 3) / 6 ; h_swish(x) = x * h_sigmoid(x)
    x = x_ref[...].astype(compute_dtype)
    hsig = jnp.clip(x + 3.0, 0.0, 6.0) * (1.0 / 6.0)
    o_ref[...] = (x * hsig).astype(o_ref.dtype)


def _h_swish_2d(x2d, compute_dtype, block_bytes, vmem_limit):
    """Run the kernel over a lane-dense (rows, 128) slab."""
    rows, _ = x2d.shape
    dtype = x2d.dtype
    itemsize = jnp.dtype(dtype).itemsize
    sub = max(8, 32 // itemsize)                 # sublanes per vreg for dtype
    target_rows = block_bytes // (_LANE * itemsize)

    if rows <= sub:
        tile_rows = rows                         # full-extent block (legal)
    elif rows <= target_rows and rows >= 2 * sub:
        # Small/mid tensors: split into >=2 blocks so both v7x TCs get work.
        tile_rows = _round_up(pl.cdiv(rows, 2), sub)
    else:
        tile_rows = min(target_rows, _round_up(rows, sub))

    grid = (pl.cdiv(rows, tile_rows),)

    return pl.pallas_call(
        functools.partial(_h_swish_kernel, compute_dtype=compute_dtype),
        out_shape=jax.ShapeDtypeStruct((rows, _LANE), dtype),
        grid_spec=pltpu.PrefetchScalarGridSpec(
            num_scalar_prefetch=0,
            grid=grid,
            in_specs=[pl.BlockSpec((tile_rows, _LANE), lambda i: (i, 0))],
            out_specs=pl.BlockSpec((tile_rows, _LANE), lambda i: (i, 0)),
        ),
        compiler_params=pltpu.CompilerParams(
            dimension_semantics=("parallel",),
            vmem_limit_bytes=vmem_limit,
        ),
        cost_estimate=pl.CostEstimate(
            flops=4 * rows * _LANE,
            transcendentals=0,
            bytes_accessed=2 * rows * _LANE * itemsize,
        ),
    )(x2d)


@jax.jit
def h_swish(x: jax.Array) -> jax.Array:
    """Elementwise hard-swish, NCHW in -> NCHW out, same dtype."""
    if not jnp.issubdtype(x.dtype, jnp.floating):
        raise TypeError(f"h_swish expects a floating dtype, got {x.dtype}")

    block_bytes, vmem_limit, has_bf16_vpu = _chip_tuning()
    compute_dtype = (
        x.dtype
        if (x.dtype in (jnp.bfloat16, jnp.float16) and has_bf16_vpu)
        else jnp.float32
    )

    orig_shape = x.shape
    flat = x.reshape(-1)                 # contiguous reshape: free under jit
    n = flat.shape[0]
    n_main = n - (n % _LANE)             # lane-aligned prefix length

    def _tail_hswish(t):
        tc = t.astype(compute_dtype)
        return (tc * (jnp.clip(tc + 3.0, 0.0, 6.0) * (1.0 / 6.0))).astype(t.dtype)

    if n_main == 0:
        # Entire tensor smaller than one lane row: kernel not worth launching.
        return _tail_hswish(flat).reshape(orig_shape)

    out_main = _h_swish_2d(
        flat[:n_main].reshape(n_main // _LANE, _LANE),
        compute_dtype, block_bytes, vmem_limit,
    ).reshape(-1)

    if n_main == n:                      # fast path: lane-aligned (typical)
        return out_main.reshape(orig_shape)

    # Ragged tail (<128 elems): tiny jnp epilogue on the tail only; the
    # concatenate is the only extra copy (vs. the old full pad + slice passes).
    # TODO(synk): fold the tail into the kernel's last block via a masked
    # store to eliminate the concatenate entirely.
    out = jnp.concatenate([out_main, _tail_hswish(flat[n_main:])])
    return out.reshape(orig_shape)


if __name__ == "__main__":
    key = jax.random.PRNGKey(0)
    x = jax.random.normal(key, (2, 4, 16, 16), dtype=jnp.float32)  # NCHW

    out = h_swish(x)
    jax.block_until_ready(out)

    # Reference check (plain JAX), f32 path.
    ref = x * (jnp.clip(x + 3.0, 0.0, 6.0) / 6.0)
    assert out.shape == x.shape and out.dtype == x.dtype
    assert jnp.allclose(out, ref, atol=1e-6), "f32 mismatch vs reference"

    # bf16 path (native-dtype compute on v6e/v7x, f32 compute on v5e).
    xb = x.astype(jnp.bfloat16)
    outb = h_swish(xb)
    jax.block_until_ready(outb)
    xb32 = xb.astype(jnp.float32)
    refb = xb32 * (jnp.clip(xb32 + 3.0, 0.0, 6.0) / 6.0)
    assert outb.shape == xb.shape and outb.dtype == jnp.bfloat16
    assert jnp.allclose(outb.astype(jnp.float32), refb, atol=1e-1), "bf16 mismatch"

    print("KERNEL_OK")
</pallas_src>

<mosaic_0001>
module attributes {stable_mosaic.version = 11 : i64} {
  func.func @_h_swish_kernel(%arg0: i32, %arg1: memref<8x128xf32, #tpu.memory_space<vmem>>, %arg2: memref<8x128xf32, #tpu.memory_space<vmem>>) attributes {dimension_semantics = [#tpu.dimension_semantics<parallel>], iteration_bounds = array<i64: 2>, scalar_prefetch = 0 : i64, scratch_operands = 0 : i64, tpu.core_type = #tpu.core_type<tc>, window_params = [{transform_indices = @transform_0, window_bounds = array<i64: 8, 128>}, {transform_indices = @transform_1, window_bounds = array<i64: 8, 128>}]} {
    %c0 = arith.constant 0 : index
    %c0_0 = arith.constant 0 : index
    %0 = vector.load %arg1[%c0, %c0_0] : memref<8x128xf32, #tpu.memory_space<vmem>>, vector<8x128xf32>
    %cst = arith.constant 3.000000e+00 : f32
    %1 = vector.broadcast %cst : f32 to vector<8x128xf32>
    %2 = arith.addf %0, %1 : vector<8x128xf32>
    %cst_1 = arith.constant 0.000000e+00 : f32
    %cst_2 = arith.constant 6.000000e+00 : f32
    %3 = vector.broadcast %cst_1 : f32 to vector<8x128xf32>
    %4 = arith.maximumf %3, %2 : vector<8x128xf32>
    %5 = vector.broadcast %cst_2 : f32 to vector<8x128xf32>
    %6 = arith.minimumf %5, %4 : vector<8x128xf32>
    %cst_3 = arith.constant 0.166666672 : f32
    %7 = vector.broadcast %cst_3 : f32 to vector<8x128xf32>
    %8 = arith.mulf %6, %7 : vector<8x128xf32>
    %9 = arith.mulf %0, %8 : vector<8x128xf32>
    %c0_4 = arith.constant 0 : index
    %c0_5 = arith.constant 0 : index
    %10 = vector.load %arg2[%c0_4, %c0_5] : memref<8x128xf32, #tpu.memory_space<vmem>>, vector<8x128xf32>
    tpu.vector_store %arg2[%c0_4, %c0_5], %9 {strides = array<i32>} : memref<8x128xf32, #tpu.memory_space<vmem>>, vector<8x128xf32>,
    return
  }
  func.func @transform_0(%arg0: i32) -> (i32, i32) {
    %c0_i32 = arith.constant 0 : i32
    %c0_i32_0 = arith.constant 0 : i32
    return %arg0, %c0_i32 : i32, i32
  }
  func.func @transform_1(%arg0: i32) -> (i32, i32) {
    %c0_i32 = arith.constant 0 : i32
    %c0_i32_0 = arith.constant 0 : i32
    return %arg0, %c0_i32 : i32, i32
  }
}

</mosaic_0001>

<bundles_post_ra>
// kernel: h_swish.1
= control target key start
LH: loop header
LB: loop body
LE: loop exit
PB: predicated region body
PF: predicated region fallthrough
CT: control target
= control target key end

     0   :  { %s193_s6 = smov 0   ;;  %s213_s0 = inlined_call_operand.vmem [shape: f32[16,128], index: 0, kind: input, shape index: {}]   ;;  %s214_s1 = inlined_call_operand.vmem [shape: f32[16,128], index: 1, kind: output, shape index: {}]  }
   0x1 LB: > { %s172_s7 = sadd.s32 4294967295, %s195_s6   ;;  %p176_p0 = scmp.ge.s32.totalorder %s195_s6, 1  ;;  %s195_s6 = sphi %s193_s6, %s11_s6  }
   0x2   : > { %p86_p1 = scmp.lt.s32.totalorder %s195_s6, 3 }
   0x4   : > { %p87_p2 = pnand %p176_p0, %p86_p1 }
   0x5   : > { %p104_p3 = scmp.lt.s32.totalorder (!%p87_p2), %s172_s7, 1 }
   0x6   : > { %90 = sbr.rel (%p87_p2) target bundleno = 26 (0x1a), region = 24 }
   0xb   : > { %s216_s7 = smov (!%p104_p3, %s172_s7), 1 }
   0xc   : > { %s177_s8 = sshll.u32 %s216_s7, 3 }
   0xd   : > { %s107_s11 = scalar_lea.vmem %s213_s0, %s177_s8  ;;  %s111_s14 = scalar_lea.vmem %s214_s1, %s177_s8 }
   0xe   : > { %v112_v0 = vld [vmem:[%s107_s11] sm:$0xff] }
   0xf   : > { %v113_v1 = vadd.f32 3.0, %v112_v0 }
  0x11   : > { %v114_v2 = vmax.f32 %v113_v1, 0.0 }
  0x13   : > { %v115_v3 = vmin.f32 %v114_v2, 6.0 }
  0x15   : > { %v116_v4 = vmul.f32 0.16666667, %v115_v3 }
  0x17   : > { %v117_v5 = vmul.f32 %v116_v4, %v112_v0 }
  0x19   : > { %118 = vst [vmem:[%s111_s14] sm:$0xff] %v117_v5 }
  0x1a PF: > { %s11_s6 = sadd.s32 1, %s195_s6  }
  0x1b   : > { %p8_p4 = scmp.ge.s32.totalorder %s11_s6, 4  }
  0x1d   :  { %10 = sbr.rel (!%p8_p4) target bundleno = 1 (0x1), region = 54 }

</bundles_post_ra>
